<compile_context>
chip_gen: v7x
topology: tpu7x:2x2x1
jax: 0.10.0
libtpu: 0.0.40
codegen_flags: <defaults>
</compile_context>

<pallas_src>
import functools

import jax
import jax.numpy as jnp
from jax import lax
from jax.experimental import pallas as pl
from jax.experimental.pallas import tpu as pltpu


# ----------------------------------------------------------------------------
# Pallas kernel: one fused matmul per (batch, spatial-tile) grid point.
# ----------------------------------------------------------------------------
def _inception_fused_kernel(w_ref, p_ref, o_ref):
    # w_ref: (3*Cout, Kp)     bf16 packed weights^T (biases folded in)
    # p_ref: (1, Kp, tile)    bf16 im2col patches (channels-major, spatial in lanes)
    # o_ref: (1, 3*Cout, tile) f32 lane-dense output
    acc = jnp.dot(w_ref[...], p_ref[0], preferred_element_type=jnp.float32)
    o_ref[0] = acc.astype(o_ref.dtype)


def _round_up(x, m):
    return ((x + m - 1) // m) * m


def pack_weights(params):
    """Pack the 3 branches + biases into one (3*Cout, Kp) bf16 matrix.

    Row ordering of the contraction axis is (kh, kw, c), c fastest, matching
    the im2col slab built by `build_patches`. The last real row is the bias
    (paired with an all-ones row in the patches).
    """
    w1, b1 = params["w1"], params["b1"]
    w3, b3 = params["w3"], params["b3"]
    w5, b5 = params["w5"], params["b5"]
    C = w1.shape[2]
    Cout = w1.shape[3]

    wfull = jnp.zeros((5, 5, C, 3 * Cout), jnp.float32)
    wfull = wfull.at[2:3, 2:3, :, 0:Cout].set(w1)            # 1x1, centered
    wfull = wfull.at[1:4, 1:4, :, Cout:2 * Cout].set(w3)     # 3x3, centered
    wfull = wfull.at[:, :, :, 2 * Cout:3 * Cout].set(w5)     # 5x5

    wmat = wfull.reshape(25 * C, 3 * Cout)
    bias = jnp.concatenate([b1, b3, b5], axis=-1)            # (1, 3*Cout)
    wmat = jnp.concatenate([wmat, bias], axis=0)             # (25*C + 1, 3*Cout)

    K = wmat.shape[0]
    Kp = _round_up(K, 8)
    wmat = jnp.pad(wmat, ((0, Kp - K), (0, 0)))
    return jnp.transpose(wmat, (1, 0)).astype(jnp.bfloat16)  # (3*Cout, Kp)


def build_patches(x_nchw, Kp):
    """Channels-major im2col: (N, Kp, H*W) bf16, rows ordered (kh, kw, c)."""
    N, C, H, W = x_nchw.shape
    xp = jnp.pad(x_nchw, ((0, 0), (0, 0), (2, 2), (2, 2)))   # pad=2 for 5x5
    slabs = []
    for kh in range(5):
        for kw in range(5):
            slabs.append(xp[:, :, kh:kh + H, kw:kw + W].reshape(N, C, H * W))
    patches = jnp.concatenate(slabs, axis=1)                 # (N, 25*C, H*W)
    ones = jnp.ones((N, 1, H * W), patches.dtype)            # bias row
    patches = jnp.concatenate([patches, ones], axis=1)       # (N, 25*C+1, H*W)
    K = patches.shape[1]
    patches = jnp.pad(patches, ((0, 0), (0, Kp - K), (0, 0)))
    return patches.astype(jnp.bfloat16)


def inception_pallas(patches, w_packed, out_dtype):
    """patches: (N, Kp, HW) bf16; w_packed: (Mout, Kp) bf16 -> (N, Mout, HW)."""
    N, Kp, HW = patches.shape
    Mout = w_packed.shape[0]

    # Lane tile: 256 for v6e/v7x MXU width, 128 for v5e-friendly fallback.
    if HW % 256 == 0:
        tile = 256
    elif HW % 128 == 0:
        tile = 128
    else:
        tile = HW
    grid = (N, HW // tile)

    return pl.pallas_call(
        _inception_fused_kernel,
        out_shape=jax.ShapeDtypeStruct((N, Mout, HW), out_dtype),
        grid_spec=pltpu.PrefetchScalarGridSpec(
            num_scalar_prefetch=0,
            grid=grid,
            in_specs=[
                pl.BlockSpec((Mout, Kp), lambda n, s: (0, 0)),
                pl.BlockSpec((1, Kp, tile), lambda n, s: (n, 0, s)),
            ],
            out_specs=pl.BlockSpec((1, Mout, tile), lambda n, s: (n, 0, s)),
        ),
        compiler_params=pltpu.CompilerParams(
            dimension_semantics=("parallel", "parallel"),
            vmem_limit_bytes=32 * 1024 * 1024,
        ),
    )(w_packed, patches)


def init_params(key, input_nc):
    """Deterministic parameter init. Weights in HWIO layout (kh, kw, Cin, Cout)."""
    ks = jax.random.split(key, 6)
    Cout = input_nc
    w1 = 0.1 * jax.random.normal(ks[0], (1, 1, input_nc, Cout), jnp.float32)
    b1 = 0.1 * jax.random.normal(ks[1], (1, Cout), jnp.float32)
    w3 = 0.1 * jax.random.normal(ks[2], (3, 3, input_nc, Cout), jnp.float32)
    b3 = 0.1 * jax.random.normal(ks[3], (1, Cout), jnp.float32)
    w5 = 0.1 * jax.random.normal(ks[4], (5, 5, input_nc, Cout), jnp.float32)
    b5 = 0.1 * jax.random.normal(ks[5], (1, Cout), jnp.float32)
    return dict(w1=w1, b1=b1, w3=w3, b3=b3, w5=w5, b5=b5)


@jax.jit
def together_forward(x_nchw, pre_out_nchw, params):
    # Reproduce the (unused) concat from the PyTorch forward; XLA DCEs it.
    tmp = jnp.concatenate([pre_out_nchw, x_nchw], axis=1)  # noqa: F841 (dead, as in reference)

    N, C, H, W = x_nchw.shape
    Cout = params["w1"].shape[-1]

    w_packed = pack_weights(params)                 # (3*Cout, Kp) bf16
    Kp = w_packed.shape[1]
    patches = build_patches(x_nchw, Kp)             # (N, Kp, H*W) bf16

    out_flat = inception_pallas(patches, w_packed, x_nchw.dtype)  # (N, 3*Cout, H*W)
    # Zero-cost reshape straight to NCHW (no transpose needed).
    return out_flat.reshape(N, 3 * Cout, H, W)


def _reference_forward(x_nchw, params):
    """Pure-JAX reference (lax conv, f32 math on bf16-rounded operands)."""
    def r(a):
        return a.astype(jnp.bfloat16).astype(jnp.float32)

    x_nhwc = jnp.transpose(r(x_nchw), (0, 2, 3, 1))
    dn = lax.conv_dimension_numbers(x_nhwc.shape, params["w1"].shape,
                                    ("NHWC", "HWIO", "NHWC"))

    def branch(w, b, pad):
        y = lax.conv_general_dilated(x_nhwc, r(w), (1, 1),
                                     ((pad, pad), (pad, pad)),
                                     dimension_numbers=dn,
                                     precision=lax.Precision.HIGHEST)
        return y + r(b).reshape(1, 1, 1, -1)

    o1 = branch(params["w1"], params["b1"], 0)
    o3 = branch(params["w3"], params["b3"], 1)
    o5 = branch(params["w5"], params["b5"], 2)
    out_nhwc = jnp.concatenate([o1, o3, o5], axis=-1)
    return jnp.transpose(out_nhwc, (0, 3, 1, 2))


if __name__ == "__main__":
    key = jax.random.PRNGKey(0)
    k_x, k_pre, k_p = jax.random.split(key, 3)

    N, C, H, W = 2, 4, 16, 16
    x = jax.random.normal(k_x, (N, C, H, W), jnp.float32)       # NCHW, like PyTorch
    pre_out = jax.random.normal(k_pre, (N, C, H, W), jnp.float32)

    params = init_params(k_p, input_nc=C)

    out = together_forward(x, pre_out, params)
    out = jax.block_until_ready(out)

    ref = _reference_forward(x, params)
    assert out.shape == (N, 3 * C, H, W), out.shape
    err = float(jnp.max(jnp.abs(out - ref)))
    assert err < 1e-2, err   # bf16 operands, f32 accumulation

    print("KERNEL_OK")
</pallas_src>

<mosaic_0001>
module attributes {stable_mosaic.version = 11 : i64} {
  func.func @_inception_fused_kernel(%arg0: i32, %arg1: i32, %arg2: memref<12x104xbf16, #tpu.memory_space<vmem>>, %arg3: memref<1x104x256xbf16, #tpu.memory_space<vmem>>, %arg4: memref<1x12x256xf32, #tpu.memory_space<vmem>>) attributes {dimension_semantics = [#tpu.dimension_semantics<parallel>, #tpu.dimension_semantics<parallel>], iteration_bounds = array<i64: 2, 1>, scalar_prefetch = 0 : i64, scratch_operands = 0 : i64, tpu.core_type = #tpu.core_type<tc>, window_params = [{pipeline_mode = #tpu.pipeline_mode<synchronous>, transform_indices = @transform_0, window_bounds = array<i64: 12, 104>}, {transform_indices = @transform_1, window_bounds = array<i64: 1, 104, 256>}, {transform_indices = @transform_2, window_bounds = array<i64: 1, 12, 256>}]} {
    %c0 = arith.constant 0 : index
    %c0_0 = arith.constant 0 : index
    %0 = vector.load %arg2[%c0, %c0_0] : memref<12x104xbf16, #tpu.memory_space<vmem>>, vector<12x104xbf16>
    %c0_1 = arith.constant 0 : index
    %c0_2 = arith.constant 0 : index
    %c0_3 = arith.constant 0 : index
    %1 = vector.load %arg3[%c0_1, %c0_2, %c0_3] : memref<1x104x256xbf16, #tpu.memory_space<vmem>>, vector<1x104x256xbf16>
    %2 = vector.shape_cast %1 : vector<1x104x256xbf16> to vector<104x256xbf16>
    %cst = arith.constant dense<0.000000e+00> : vector<12x256xf32>
    %3 = tpu.matmul %0, %2, %cst {dimension_numbers = #tpu.dot_dimension_numbers<[1], [0], [0], [1], [0, 0, 1, 1], [], []>} : vector<12x104xbf16>, vector<104x256xbf16>, vector<12x256xf32> -> vector<12x256xf32>
    %c0_4 = arith.constant 0 : index
    %c0_5 = arith.constant 0 : index
    %c0_6 = arith.constant 0 : index
    %4 = vector.load %arg4[%c0_4, %c0_5, %c0_6] : memref<1x12x256xf32, #tpu.memory_space<vmem>>, vector<1x12x256xf32>
    %5 = vector.shape_cast %4 : vector<1x12x256xf32> to vector<12x256xf32>
    %6 = vector.shape_cast %3 : vector<12x256xf32> to vector<1x12x256xf32>
    tpu.vector_store %arg4[%c0_4, %c0_5, %c0_6], %6 {strides = array<i32>} : memref<1x12x256xf32, #tpu.memory_space<vmem>>, vector<1x12x256xf32>,
    return
  }
  func.func @transform_0(%arg0: i32, %arg1: i32) -> (i32, i32) {
    %c0_i32 = arith.constant 0 : i32
    %c0_i32_0 = arith.constant 0 : i32
    %c0_i32_1 = arith.constant 0 : i32
    return %c0_i32, %c0_i32_0 : i32, i32
  }
  func.func @transform_1(%arg0: i32, %arg1: i32) -> (i32, i32, i32) {
    %c0_i32 = arith.constant 0 : i32
    %c0_i32_0 = arith.constant 0 : i32
    return %arg0, %c0_i32, %arg1 : i32, i32, i32
  }
  func.func @transform_2(%arg0: i32, %arg1: i32) -> (i32, i32, i32) {
    %c0_i32 = arith.constant 0 : i32
    %c0_i32_0 = arith.constant 0 : i32
    return %arg0, %c0_i32, %arg1 : i32, i32, i32
  }
}

</mosaic_0001>

<bundles_post_ra>
// kernel: together_forward.1
= control target key start
LH: loop header
LB: loop body
LE: loop exit
PB: predicated region body
PF: predicated region fallthrough
CT: control target
= control target key end

     0   :  { %s529_s9 = smov 0   ;;  %s531_s10 = smov 0   ;;  %s569_s0 = inlined_call_operand.vmem [shape: bf16[12,104], index: 0, kind: input, shape index: {}]   ;;  %s570_s1 = inlined_call_operand.vmem [shape: bf16[2,104,256], index: 1, kind: input, shape index: {}]   ;;  %s571_s2 = inlined_call_operand.vmem [shape: f32[2,12,256], index: 2, kind: output, shape index: {}]  }
   0x1   :  { %s533_s11 = smov 0  }
   0x2 LB: > { %s24_s12 = sadd.s32 1, %s507_s10  ;;  %p418_p0 = scmp.ge.s32.totalorder %s511_s11, 1  ;;  %s511_s11 = sphi %s533_s11, %s12_s11   ;;  %s507_s10 = sphi %s531_s10, %s573_s10   ;;  %s503_s9 = sphi %s529_s9, %s572_s9  }
   0x3   : > { %p26_p1 = scmp.ge.s32.totalorder %s24_s12, 2  ;;  %p133_p2 = scmp.lt.s32.totalorder %s511_s11, 3 }
   0x5   : > { %s575_s12 = smov (%p26_p1, %s24_s12), 0  ;;  %p134_p3 = pnand %p418_p0, %p133_p2 }
   0x6   : > { %p164_p4 = scmp.lt.s32.totalorder (!%p134_p3), %s503_s9, 1  ;;  %v513_v0 = vmov (!%p134_p3), 0   ;;  %vm273_vm0 = vcmask (!%p134_p3), 1043456   ;;  %v488_v17 = vld [vmem:[%s569_s0] sm:$0x3f] (!%p134_p3)   ;;  %vm269_vm1 = vcmask (!%p134_p3), 850944  }
   0x7   : > { %137 = sbr.rel (%p134_p3) target bundleno = 263 (0x107), region = 28  ;;  %312 = vmatprep.mubr.bf16.mxu0 (!%p134_p3), %v513_v0 }
   0xe   : > { %s577_s9 = smov (!%p164_p4, %s503_s9), 1 }
   0xf   : > { %s442_s13 = smul.u32 104, %s577_s9  ;;  %s441_s19 = sshll.u32 %s577_s9, 5 }
  0x10   : > { %s181_s22 = scalar_lea.vmem %s571_s2, %s441_s19 }
  0x11   : > { %s171_s16 = scalar_lea.vmem %s570_s1, %s442_s13 }
  0x12   : > { %v468_v1 = vld [vmem:[%s171_s16 + $0x4] ss:$8 sps:$4 sm:$0xff]   ;;  %v470_v2 = vld [vmem:[%s171_s16] ss:$8 sps:$4 sm:$0xff]   ;;  %v471_v3 = vld [vmem:[%s171_s16 + $0x14] ss:$8 sps:$4 sm:$0xff]  }
  0x13   : > { %280 = vmatprep.subr.bf16.mxu0 %v468_v1  ;;  %v473_v4 = vld [vmem:[%s171_s16 + $0x10] ss:$8 sps:$4 sm:$0xff]   ;;  %v474_v5 = vld [vmem:[%s171_s16 + $0x24] ss:$8 sps:$4 sm:$0xff]   ;;  %v476_v6 = vld [vmem:[%s171_s16 + $0x20] ss:$8 sps:$4 sm:$0xff]  }
  0x14   : > { %281 = vmatpush1.bf16.msra.mxu0 %v470_v2  ;;  %v477_v7 = vld [vmem:[%s171_s16 + $0x34] ss:$8 sps:$4 sm:$0xff]   ;;  %v479_v8 = vld [vmem:[%s171_s16 + $0x30] ss:$8 sps:$4 sm:$0xff]   ;;  %v480_v9 = vld [vmem:[%s171_s16 + $0x44] ss:$8 sps:$4 sm:$0xff]  }
  0x15   : > { %282 = vmatprep.subr.bf16.mxu0 %v471_v3  ;;  %v482_v10 = vld [vmem:[%s171_s16 + $0x40] ss:$8 sps:$4 sm:$0xff]   ;;  %v483_v11 = vld [vmem:[%s171_s16 + $0x54] ss:$8 sps:$4 sm:$0xff]   ;;  %v485_v13 = vld [vmem:[%s171_s16 + $0x50] ss:$8 sps:$4 sm:$0xff]  }
  0x16   : > { %v198_v12 = vld [vmem:[%s171_s16 + $0x60] sm:$0xff] }
  0x17   : > { %v436_v14 = vcombine.high %v198_v12, %v198_v12  ;;  %v435_v15 = vcombine.low %v198_v12, %v198_v12 }
  0x18   : > { %283 = vmatpush1.bf16.msra.mxu0 %v473_v4 }
  0x19   : > { %284 = vmatprep.subr.bf16.mxu0 %v474_v5  ;;  %v275_v16 = vsel %vm273_vm0, %v435_v15, 0 }
  0x1c   : > { %285 = vmatpush1.bf16.msra.mxu0 %v476_v6 }
  0x1d   : > { %286 = vmatprep.subr.bf16.mxu0 %v477_v7 }
  0x20   : > { %287 = vmatpush1.bf16.msra.mxu0 %v479_v8 }
  0x21   : > { %288 = vmatprep.subr.bf16.mxu0 %v480_v9 }
  0x24   : > { %289 = vmatpush1.bf16.msra.mxu0 %v482_v10 }
  0x25   : > { %290 = vmatprep.subr.bf16.mxu0 %v483_v11 }
  0x28   : > { %291 = vmatpush1.bf16.msra.mxu0 %v485_v13 }
  0x29   : > { %437 = vmatprep.subr.msk.bf16.mxu0 %vm273_vm0, %v436_v14 }
  0x2c   : > { %293 = vmatpush1.bf16.msra.mxu0 %v275_v16 }
  0x2f   : > { %438 = vmatmul.mubr.msk.bf16.vlgmr.msra.gmra.mrb[0].mxu0 %vm269_vm1, %v488_v17 }
 0x102   : > { %v314_v18 = vpop.f32.mrb[0].mxu0 }
 0x103   : > { %323 = vst [vmem:[%s181_s22] sm:$0xff] %v314_v18  ;;  %v316_v19 = vpop.f32.mrb[1].mxu0 }
 0x104   : > { %324 = vst [vmem:[%s181_s22 + $0x8] sm:$0xff] %v316_v19  ;;  %v318_v20 = vpop.f32.mrb[2].mxu0 }
 0x105   : > { %325 = vst [vmem:[%s181_s22 + $0x10] sm:$0xf] %v318_v20  ;;  %v320_v21 = vpop.f32.mrb[3].mxu0 }
 0x106   : > { %326 = vst [vmem:[%s181_s22 + $0x18] sm:$0xf] %v320_v21 }
 0x107 PF: > { %s12_s11 = sadd.s32 1, %s511_s11   ;;  %s572_s9 = smov %s507_s10 }
 0x108   : > { %p9_p5 = scmp.ge.s32.totalorder %s12_s11, 4   ;;  %s573_s10 = smov %s575_s12 }
 0x10a   :  { %11 = sbr.rel (!%p9_p5) target bundleno = 2 (0x2), region = 58 }

</bundles_post_ra>
